<compile_context>
chip_gen: v5e
topology: v5e:2x2
jax: 0.10.0
libtpu: 0.0.40
codegen_flags: <defaults>
</compile_context>

<pallas_src>
import numpy as np
import jax
import jax.numpy as jnp
from jax import lax
from jax.experimental import pallas as pl
from jax.experimental.pallas import tpu as pltpu


def dct_ii_matrix_np(n):
    """Orthonormal DCT-II matrix C: C[k, m] = a(k) * cos(pi*(2m+1)*k / (2n))."""
    k = np.arange(n)[:, None].astype(np.float64)
    m = np.arange(n)[None, :].astype(np.float64)
    mat = np.cos(np.pi * (2.0 * m + 1.0) * k / (2.0 * n))
    scale = np.full((n, 1), np.sqrt(2.0 / n))
    scale[0, 0] = np.sqrt(1.0 / n)
    return mat * scale


def stacked_idct_pool_operator_np(H, W, pool=2):
    """(H*W, pool*pool*Ho*Wo) operator. Column group g=(p,q) evaluates the 2-D
    orthonormal iDCT-II at pooling phase (p, q) of the 2x2/stride-2 grid, so the
    elementwise max over the four groups equals MaxPool2d(2, 2) of the iDCT image."""
    A = dct_ii_matrix_np(H).T          # A[i, u] = C_H[u, i]
    B = dct_ii_matrix_np(W)            # B[v, j] = C_W[v, j]
    Ho, Wo = (H - pool) // 2 + 1, (W - pool) // 2 + 1
    blocks = []
    for p in range(pool):
        for q in range(pool):
            Ap = A[p::2, :]            # (Ho, H)
            Bq = B[:, q::2]            # (W, Wo)
            blocks.append(np.einsum("iu,vj->uvij", Ap, Bq).reshape(H * W, Ho * Wo))
    return np.concatenate(blocks, axis=1)


def _fused_kernel(patches_ref, x_ref, idct_ref, w_ref, bias_ref, out_ref, rhs_ref):
    """One grid step processes a block of B batch elements.

    Layouts (rows=sublanes, cols=lanes):
      patches_ref : (K, B*R)      bf16   im2col of the 3x3/s2 conv, cols (b, io, jo)
      x_ref       : (B*Cin, HW)   bf16   input images, rows (b, c), cols (u, v)
      idct_ref    : (HW, 4*R)     bf16   stacked 4-phase iDCT+pool operator
      w_ref       : (Cout2, K+Cin) bf16  [folded-conv weight | 1x1 spectral weight]
      bias_ref    : (Cout2, 1)    f32    fused bias
      out_ref     : (Cout2, B*R)         output, cols (b, io, jo)
      rhs_ref     : (K+Cin, B*R)  f32    scratch: fused matmul RHS
    """
    f32 = jnp.float32
    K = patches_ref.shape[0]
    KC, BR = rhs_ref.shape
    Cin = KC - K
    R = idct_ref.shape[1] // 4
    B = BR // R

    # Conv branch: im2col patches go straight into the fused-RHS scratch (rows 0:K).
    rhs_ref[0:K, :] = patches_ref[...].astype(f32)

    # Spectral branch: ONE stacked 4-phase iDCT matmul (bf16 in, f32 accumulation).
    spec4 = jnp.dot(x_ref[...], idct_ref[...], preferred_element_type=f32)   # (B*Cin, 4R)
    # 2x2 / stride-2 max-pool == elementwise max over the four phase images.
    pooled = jnp.maximum(jnp.maximum(spec4[:, 0:R], spec4[:, R:2 * R]),
                         jnp.maximum(spec4[:, 2 * R:3 * R], spec4[:, 3 * R:4 * R]))
    # Re-lay pooled rows (b, c) -> RHS rows c, lane block b (B is small & static).
    for b in range(B):
        rhs_ref[K:KC, b * R:(b + 1) * R] = pooled[b * Cin:(b + 1) * Cin, :]

    # Single fused matmul over the concatenated contraction [patches ; pooled] + bias.
    out_ref[...] = (jnp.dot(w_ref[...], rhs_ref[...].astype(jnp.bfloat16),
                            preferred_element_type=f32)
                    + bias_ref[...]).astype(out_ref.dtype)


def inverse_dct_conv_block_forward(x, params, *, kernel_size=3, stride=2, padding=1,
                                   pool=2, batch_block=None, out_dtype=jnp.float32):
    wconv, bconv, w1, b1 = (params["conv_w"], params["conv_b"],
                            params["w1x1"], params["b1x1"])
    N, Cin, H, W = x.shape
    Cout = wconv.shape[0]
    Cout2 = w1.shape[0]
    kh = kw = kernel_size
    Ho = (H + 2 * padding - kh) // stride + 1
    Wo = (W + 2 * padding - kw) // stride + 1
    Hp = (H - pool) // 2 + 1
    Wp = (W - pool) // 2 + 1
    assert pool == 2 and H % 2 == 0 and W % 2 == 0
    assert (Ho, Wo) == (Hp, Wp), "conv / pooled-spectral spatial dims must match for cat"
    assert w1.shape[1] == Cout + Cin

    K = Cin * kh * kw
    KC = K + Cin
    R = Ho * Wo
    HW = H * W
    bf16 = jnp.bfloat16

    # ---- batch-block heuristic: make the output lane dim B*R >= 128 (full-lane vst).
    # (On v7x one may instead cap B at cdiv(N, 2) so >=2 "parallel" grid steps span
    #  both TensorCores; on v5e/v6e a single step minimizes fixed per-step overhead.)
    if batch_block is None:
        B = max(1, min(N, pl.cdiv(128, R)))
    else:
        B = max(1, min(int(batch_block), N))
    if (B * R) % 128 != 0 or (B * Cin) % 8 != 0:
        B = N  # full-dim blocks are always legal regardless of (8,128) divisibility
    Np = pl.cdiv(N, B) * B
    if Np != N:
        x = jnp.pad(x, ((0, Np - N), (0, 0), (0, 0), (0, 0)))
    steps = Np // B

    # ---- constant: stacked 4-phase iDCT+pool operator (built in numpy, cast to bf16).
    idct_op = jnp.asarray(stacked_idct_pool_operator_np(H, W, pool), dtype=bf16)  # (HW, 4R)

    # ---- fold the 3x3-conv weights/bias through the 1x1 conv (exact; path is linear),
    #      and concatenate with the spectral half of the 1x1 weight -> one fused weight.
    w1c = w1[:, :Cout, 0, 0]                                   # (Cout2, Cout)
    w1s = w1[:, Cout:, 0, 0]                                   # (Cout2, Cin)
    wconv_flat = wconv.reshape(Cout, K)
    w_all = jnp.concatenate([w1c @ wconv_flat, w1s], axis=1).astype(bf16)   # (Cout2, K+Cin)
    b_fused = (w1c @ bconv + b1).reshape(Cout2, 1).astype(jnp.float32)

    # ---- im2col for the strided 3x3 conv: rows=(c,ky,kx), cols=(n,io,jo).
    # TODO(synk): move this gather in-kernel to avoid the extra HBM round trip.
    x_pad = jnp.pad(x, ((0, 0), (0, 0), (padding, padding), (padding, padding)))
    taps = [x_pad[:, :, ky:ky + stride * Ho:stride, kx:kx + stride * Wo:stride]
            for ky in range(kh) for kx in range(kw)]           # each (Np, Cin, Ho, Wo)
    patches = jnp.stack(taps, axis=2)                          # (Np, Cin, kh*kw, Ho, Wo)
    patches = patches.transpose(1, 2, 0, 3, 4).reshape(K, Np * R).astype(bf16)

    # Rows=(n,c) / flattened-spatial-in-lanes view of x (pure reshape of NCHW).
    x_rows = x.reshape(Np * Cin, HW).astype(bf16)

    shared = lambda s: (0, 0)
    out_flat = pl.pallas_call(
        _fused_kernel,
        out_shape=jax.ShapeDtypeStruct((Cout2, Np * R), out_dtype),
        grid=(steps,),
        in_specs=[
            pl.BlockSpec((K, B * R), lambda s: (0, s)),        # im2col patches (per block)
            pl.BlockSpec((B * Cin, HW), lambda s: (s, 0)),     # x rows (per block)
            pl.BlockSpec((HW, 4 * R), shared),                 # stacked iDCT+pool operator
            pl.BlockSpec((Cout2, KC), shared),                 # fused weight [conv | spec]
            pl.BlockSpec((Cout2, 1), shared),                  # fused bias
        ],
        out_specs=pl.BlockSpec((Cout2, B * R), lambda s: (0, s)),
        scratch_shapes=[pltpu.VMEM((KC, B * R), jnp.float32)],
        compiler_params=pltpu.CompilerParams(
            dimension_semantics=("parallel",),
            vmem_limit_bytes=32 * 1024 * 1024),
    )(patches, x_rows, idct_op, w_all, b_fused)

    # (Cout2, Np*R) -> NCHW; the transpose touches only N*Cout2*R elements (~KB).
    out = out_flat.reshape(Cout2, Np, R).transpose(1, 0, 2)[:N]
    return out.reshape(N, Cout2, Ho, Wo)


def reference_forward(x, params, *, stride=2, padding=1):
    """Pure-JAX f32 reference with identical semantics (for validation)."""
    wconv, bconv, w1, b1 = (params["conv_w"], params["conv_b"],
                            params["w1x1"], params["b1x1"])
    hp = lax.Precision.HIGHEST
    N, Cin, H, W = x.shape
    conv_out = lax.conv_general_dilated(
        x, wconv, window_strides=(stride, stride),
        padding=((padding, padding), (padding, padding)),
        dimension_numbers=("NCHW", "OIHW", "NCHW"), precision=hp)
    conv_out = conv_out + bconv[None, :, None, None]
    A = jnp.asarray(dct_ii_matrix_np(H).T, jnp.float32)
    B = jnp.asarray(dct_ii_matrix_np(W), jnp.float32)
    spec = jnp.einsum("iu,ncuv,vj->ncij", A, x, B, precision=hp)
    spec_pooled = lax.reduce_window(spec, -jnp.inf, lax.max,
                                    (1, 1, 2, 2), (1, 1, 2, 2), "VALID")
    cat = jnp.concatenate([conv_out, spec_pooled], axis=1)
    out = jnp.einsum("oc,ncij->noij", w1[:, :, 0, 0], cat, precision=hp)
    return out + b1[None, :, None, None]


if __name__ == "__main__":
    # small shapes consistent with the module: width=height=16, in=4, out=8, k=3, stride=2
    N, Cin, H, W = 2, 4, 16, 16
    Cout = 8

    key = jax.random.PRNGKey(0)
    kx, kw1, kb1, kw2, kb2 = jax.random.split(key, 5)
    x = jax.random.normal(kx, (N, Cin, H, W), jnp.float32)
    params = {
        "conv_w": 0.1 * jax.random.normal(kw1, (Cout, Cin, 3, 3), jnp.float32),
        "conv_b": 0.1 * jax.random.normal(kb1, (Cout,), jnp.float32),
        "w1x1":   0.1 * jax.random.normal(kw2, (Cout, Cout + Cin, 1, 1), jnp.float32),
        "b1x1":   0.1 * jax.random.normal(kb2, (Cout,), jnp.float32),
    }

    fwd = jax.jit(inverse_dct_conv_block_forward)
    out = jax.block_until_ready(fwd(x, params))

    ref = reference_forward(x, params)
    assert out.shape == (N, Cout, H // 2, W // 2), out.shape
    # bf16 operands with f32 accumulation (incl. pooled->bf16 before the fused matmul)
    # -> validate at bf16-level tolerance.
    np.testing.assert_allclose(np.asarray(out), np.asarray(ref), atol=3e-2, rtol=3e-2)
    print("KERNEL_OK")
</pallas_src>

<mosaic_0001>
module attributes {stable_mosaic.version = 11 : i64} {
  func.func @_fused_kernel(%arg0: i32, %arg1: memref<36x128xbf16, #tpu.memory_space<vmem>>, %arg2: memref<8x256xbf16, #tpu.memory_space<vmem>>, %arg3: memref<256x256xbf16, #tpu.memory_space<vmem>>, %arg4: memref<8x40xbf16, #tpu.memory_space<vmem>>, %arg5: memref<8x1xf32, #tpu.memory_space<vmem>>, %arg6: memref<8x128xf32, #tpu.memory_space<vmem>>, %arg7: memref<40x128xf32, #tpu.memory_space<vmem>>) attributes {dimension_semantics = [#tpu.dimension_semantics<parallel>], iteration_bounds = array<i64: 1>, scalar_prefetch = 0 : i64, scratch_operands = 1 : i64, tpu.core_type = #tpu.core_type<tc>, window_params = [{transform_indices = @transform_0, window_bounds = array<i64: 36, 128>}, {transform_indices = @transform_1, window_bounds = array<i64: 8, 256>}, {pipeline_mode = #tpu.pipeline_mode<synchronous>, transform_indices = @transform_2, window_bounds = array<i64: 256, 256>}, {pipeline_mode = #tpu.pipeline_mode<synchronous>, transform_indices = @transform_3, window_bounds = array<i64: 8, 40>}, {pipeline_mode = #tpu.pipeline_mode<synchronous>, transform_indices = @transform_4, window_bounds = array<i64: 8, 1>}, {transform_indices = @transform_5, window_bounds = array<i64: 8, 128>}]} {
    %c0 = arith.constant 0 : index
    %c0_0 = arith.constant 0 : index
    %0 = vector.load %arg1[%c0, %c0_0] : memref<36x128xbf16, #tpu.memory_space<vmem>>, vector<36x128xbf16>
    %1 = arith.extf %0 : vector<36x128xbf16> to vector<36x128xf32>
    %c0_1 = arith.constant 0 : index
    %c0_2 = arith.constant 0 : index
    %2 = vector.load %arg7[%c0_1, %c0_2] : memref<40x128xf32, #tpu.memory_space<vmem>>, vector<36x128xf32>
    tpu.vector_store %arg7[%c0_1, %c0_2], %1 {strides = array<i32>} : memref<40x128xf32, #tpu.memory_space<vmem>>, vector<36x128xf32>,
    %c0_3 = arith.constant 0 : index
    %c0_4 = arith.constant 0 : index
    %3 = vector.load %arg2[%c0_3, %c0_4] : memref<8x256xbf16, #tpu.memory_space<vmem>>, vector<8x256xbf16>
    %c0_5 = arith.constant 0 : index
    %c0_6 = arith.constant 0 : index
    %4 = vector.load %arg3[%c0_5, %c0_6] : memref<256x256xbf16, #tpu.memory_space<vmem>>, vector<256x256xbf16>
    %cst = arith.constant dense<0.000000e+00> : vector<8x256xf32>
    %5 = tpu.matmul %3, %4, %cst {dimension_numbers = #tpu.dot_dimension_numbers<[1], [0], [0], [1], [0, 0, 1, 1], [], []>} : vector<8x256xbf16>, vector<256x256xbf16>, vector<8x256xf32> -> vector<8x256xf32>
    %6 = vector.extract_strided_slice %5 {offsets = [0, 0], sizes = [8, 64], strides = [1, 1]} : vector<8x256xf32> to vector<8x64xf32>
    %7 = vector.extract_strided_slice %5 {offsets = [0, 64], sizes = [8, 64], strides = [1, 1]} : vector<8x256xf32> to vector<8x64xf32>
    %8 = arith.maximumf %6, %7 : vector<8x64xf32>
    %9 = vector.extract_strided_slice %5 {offsets = [0, 128], sizes = [8, 64], strides = [1, 1]} : vector<8x256xf32> to vector<8x64xf32>
    %10 = vector.extract_strided_slice %5 {offsets = [0, 192], sizes = [8, 64], strides = [1, 1]} : vector<8x256xf32> to vector<8x64xf32>
    %11 = arith.maximumf %9, %10 : vector<8x64xf32>
    %12 = arith.maximumf %8, %11 : vector<8x64xf32>
    %13 = vector.extract_strided_slice %12 {offsets = [0, 0], sizes = [4, 64], strides = [1, 1]} : vector<8x64xf32> to vector<4x64xf32>
    %c36 = arith.constant 36 : index
    %c0_7 = arith.constant 0 : index
    %14 = vector.load %arg7[%c36, %c0_7] : memref<40x128xf32, #tpu.memory_space<vmem>>, vector<4x64xf32>
    tpu.vector_store %arg7[%c36, %c0_7], %13 {strides = array<i32>} : memref<40x128xf32, #tpu.memory_space<vmem>>, vector<4x64xf32>,
    %15 = vector.extract_strided_slice %12 {offsets = [4, 0], sizes = [4, 64], strides = [1, 1]} : vector<8x64xf32> to vector<4x64xf32>
    %c36_8 = arith.constant 36 : index
    %c64 = arith.constant 64 : index
    %16 = vector.load %arg7[%c36_8, %c64] : memref<40x128xf32, #tpu.memory_space<vmem>>, vector<4x64xf32>
    tpu.vector_store %arg7[%c36_8, %c64], %15 {strides = array<i32>} : memref<40x128xf32, #tpu.memory_space<vmem>>, vector<4x64xf32>,
    %c0_9 = arith.constant 0 : index
    %c0_10 = arith.constant 0 : index
    %17 = vector.load %arg4[%c0_9, %c0_10] : memref<8x40xbf16, #tpu.memory_space<vmem>>, vector<8x40xbf16>
    %c0_11 = arith.constant 0 : index
    %c0_12 = arith.constant 0 : index
    %18 = vector.load %arg7[%c0_11, %c0_12] : memref<40x128xf32, #tpu.memory_space<vmem>>, vector<40x128xf32>
    %19 = arith.truncf %18 : vector<40x128xf32> to vector<40x128xbf16>
    %cst_13 = arith.constant dense<0.000000e+00> : vector<8x128xf32>
    %20 = tpu.matmul %17, %19, %cst_13 {dimension_numbers = #tpu.dot_dimension_numbers<[1], [0], [0], [1], [0, 0, 1, 1], [], []>} : vector<8x40xbf16>, vector<40x128xbf16>, vector<8x128xf32> -> vector<8x128xf32>
    %c0_14 = arith.constant 0 : index
    %c0_15 = arith.constant 0 : index
    %21 = vector.load %arg5[%c0_14, %c0_15] : memref<8x1xf32, #tpu.memory_space<vmem>>, vector<8x1xf32>
    %22 = vector.broadcast %21 : vector<8x1xf32> to vector<8x128xf32>
    %23 = arith.addf %20, %22 : vector<8x128xf32>
    %c0_16 = arith.constant 0 : index
    %c0_17 = arith.constant 0 : index
    %24 = vector.load %arg6[%c0_16, %c0_17] : memref<8x128xf32, #tpu.memory_space<vmem>>, vector<8x128xf32>
    tpu.vector_store %arg6[%c0_16, %c0_17], %23 {strides = array<i32>} : memref<8x128xf32, #tpu.memory_space<vmem>>, vector<8x128xf32>,
    return
  }
  func.func @transform_0(%arg0: i32) -> (i32, i32) {
    %c0_i32 = arith.constant 0 : i32
    %c0_i32_0 = arith.constant 0 : i32
    return %c0_i32, %arg0 : i32, i32
  }
  func.func @transform_1(%arg0: i32) -> (i32, i32) {
    %c0_i32 = arith.constant 0 : i32
    %c0_i32_0 = arith.constant 0 : i32
    return %arg0, %c0_i32 : i32, i32
  }
  func.func @transform_2(%arg0: i32) -> (i32, i32) {
    %c0_i32 = arith.constant 0 : i32
    %c0_i32_0 = arith.constant 0 : i32
    %c0_i32_1 = arith.constant 0 : i32
    return %c0_i32, %c0_i32_0 : i32, i32
  }
  func.func @transform_3(%arg0: i32) -> (i32, i32) {
    %c0_i32 = arith.constant 0 : i32
    %c0_i32_0 = arith.constant 0 : i32
    %c0_i32_1 = arith.constant 0 : i32
    return %c0_i32, %c0_i32_0 : i32, i32
  }
  func.func @transform_4(%arg0: i32) -> (i32, i32) {
    %c0_i32 = arith.constant 0 : i32
    %c0_i32_0 = arith.constant 0 : i32
    %c0_i32_1 = arith.constant 0 : i32
    return %c0_i32, %c0_i32_0 : i32, i32
  }
  func.func @transform_5(%arg0: i32) -> (i32, i32) {
    %c0_i32 = arith.constant 0 : i32
    %c0_i32_0 = arith.constant 0 : i32
    return %c0_i32, %arg0 : i32, i32
  }
}

</mosaic_0001>

<bundles_post_ra>
// kernel: inverse_dct_conv_block_forward.1
= control target key start
LH: loop header
LB: loop body
LE: loop exit
PB: predicated region body
PF: predicated region fallthrough
CT: control target
= control target key end

     0   :  { %vm299_vm0 = vcmask 519168   ;;  %vm305_vm1 = vcmask 1048068   ;;  %vm326_vm2 = vcmask 1043456   ;;  %vm322_vm3 = vcmask 326656   ;;  %s769_s2 = inlined_call_operand.vmem [shape: bf16[256,256], index: 2, kind: input, shape index: {}]   ;;  %s770_s1 = inlined_call_operand.vmem [shape: bf16[8,256], index: 1, kind: input, shape index: {}]   ;;  %s771_s0 = inlined_call_operand.vmem [shape: bf16[36,128], index: 0, kind: input, shape index: {}]   ;;  %s772_s4 = inlined_call_operand.vmem [shape: f32[8,1], index: 4, kind: input, shape index: {}]   ;;  %s773_s3 = inlined_call_operand.vmem [shape: bf16[8,40], index: 3, kind: input, shape index: {}]   ;;  %s774_s5 = inlined_call_operand.vmem [shape: f32[8,128], index: 5, kind: output, shape index: {}]  }
   0x1   :  { %v406_v0 = vld [vmem:[%s769_s2 + $0x70] sm:$0xf]  ;;  %v492_v1 = vld [vmem:[%s769_s2 + $0x74] sm:$0xf0]  ;;  %v491_v5 = vld [vmem:[%s769_s2 + $0x74] sm:$0xf] }
   0x2   :  { %v470_v2 = vld [vmem:[%s769_s2 + $0xf0] sm:$0xf]  ;;  %v407_v3 = vor.u32 %v492_v1, %v406_v0  ;;  %v508_v4 = vld [vmem:[%s769_s2 + $0xf4] sm:$0xf0]  ;;  %v408_v6 = vld [vmem:[%s769_s2 + $0x78] sm:$0xf0] }
   0x3   :  { %v471_v7 = vor.u32 %v508_v4, %v470_v2  ;;  %v411_v8 = vor.u32 %v491_v5, %v408_v6  ;;  %v507_v9 = vld [vmem:[%s769_s2 + $0xf4] sm:$0xf]  ;;  %v472_v10 = vld [vmem:[%s769_s2 + $0xf8] sm:$0xf0]  ;;  %v398_v11 = vld [vmem:[%s769_s2 + $0x60] sm:$0xf] }
   0x4   :  { %236 = vmatpush.bf16.msra.mxu0 %v407_v3  ;;  %v475_v12 = vor.u32 %v507_v9, %v472_v10  ;;  %v490_v13 = vld [vmem:[%s769_s2 + $0x64] sm:$0xf0]  ;;  %v462_v14 = vld [vmem:[%s769_s2 + $0xe0] sm:$0xf]  ;;  %v489_v18 = vld [vmem:[%s769_s2 + $0x64] sm:$0xf] }
   0x5   :  { %v506_v15 = vld [vmem:[%s769_s2 + $0xe4] sm:$0xf0]  ;;  %249 = vmatpush.bf16.msra.mxu1 %v471_v7  ;;  %262 = vmatpush.bf16.msra.mxu2 %v411_v8  ;;  %v399_v16 = vor.u32 %v490_v13, %v398_v11  ;;  %v400_v19 = vld [vmem:[%s769_s2 + $0x68] sm:$0xf0]  ;;  %v505_v20 = vld [vmem:[%s769_s2 + $0xe4] sm:$0xf] }
   0x6   :  { %v463_v17 = vor.u32 %v506_v15, %v462_v14  ;;  %275 = vmatpush.bf16.msra.mxu3 %v475_v12  ;;  %v403_v21 = vor.u32 %v489_v18, %v400_v19  ;;  %v464_v22 = vld [vmem:[%s769_s2 + $0xe8] sm:$0xf0]  ;;  %v390_v23 = vld [vmem:[%s769_s2 + $0x50] sm:$0xf]  ;;  %v488_v24 = vld [vmem:[%s769_s2 + $0x54] sm:$0xf0] }
   0x7   :  { %v467_v25 = vor.u32 %v505_v20, %v464_v22  ;;  %v454_v26 = vld [vmem:[%s769_s2 + $0xd0] sm:$0xf]  ;;  %v504_v27 = vld [vmem:[%s769_s2 + $0xd4] sm:$0xf0]  ;;  %v487_v28 = vld [vmem:[%s769_s2 + $0x54] sm:$0xf]  ;;  %v391_v29 = vor.u32 %v488_v24, %v390_v23 }
   0x8   :  { %237 = vmatpush.bf16.msra.mxu0 %v399_v16  ;;  %v392_v30 = vld [vmem:[%s769_s2 + $0x58] sm:$0xf0]  ;;  %v503_v31 = vld [vmem:[%s769_s2 + $0xd4] sm:$0xf]  ;;  %v455_v33 = vor.u32 %v504_v27, %v454_v26  ;;  %v382_v35 = vld [vmem:[%s769_s2 + $0x40] sm:$0xf] }
   0x9   :  { %v456_v32 = vld [vmem:[%s769_s2 + $0xd8] sm:$0xf0]  ;;  %250 = vmatpush.bf16.msra.mxu1 %v463_v17  ;;  %263 = vmatpush.bf16.msra.mxu2 %v403_v21  ;;  %v395_v34 = vor.u32 %v487_v28, %v392_v30  ;;  %v486_v36 = vld [vmem:[%s769_s2 + $0x44] sm:$0xf0]  ;;  %v446_v37 = vld [vmem:[%s769_s2 + $0xc0] sm:$0xf] }
   0xa   :  { %276 = vmatpush.bf16.msra.mxu3 %v467_v25  ;;  %v459_v38 = vor.u32 %v503_v31, %v456_v32  ;;  %v502_v39 = vld [vmem:[%s769_s2 + $0xc4] sm:$0xf0]  ;;  %v485_v40 = vld [vmem:[%s769_s2 + $0x44] sm:$0xf]  ;;  %v384_v41 = vld [vmem:[%s769_s2 + $0x48] sm:$0xf0]  ;;  %v383_v44 = vor.u32 %v486_v36, %v382_v35 }
   0xb   :  { %v501_v42 = vld [vmem:[%s769_s2 + $0xc4] sm:$0xf]  ;;  %v448_v43 = vld [vmem:[%s769_s2 + $0xc8] sm:$0xf0]  ;;  %v447_v45 = vor.u32 %v502_v39, %v446_v37  ;;  %v387_v46 = vor.u32 %v485_v40, %v384_v41  ;;  %v374_v47 = vld [vmem:[%s769_s2 + $0x30] sm:$0xf] }
   0xc   :  { %238 = vmatpush.bf16.msra.mxu0 %v391_v29  ;;  %v484_v48 = vld [vmem:[%s769_s2 + $0x34] sm:$0xf0]  ;;  %v438_v49 = vld [vmem:[%s769_s2 + $0xb0] sm:$0xf]  ;;  %v451_v50 = vor.u32 %v501_v42, %v448_v43  ;;  %v483_v52 = vld [vmem:[%s769_s2 + $0x34] sm:$0xf] }
   0xd   :  { %251 = vmatpush.bf16.msra.mxu1 %v455_v33  ;;  %264 = vmatpush.bf16.msra.mxu2 %v395_v34  ;;  %v500_v51 = vld [vmem:[%s769_s2 + $0xb4] sm:$0xf0]  ;;  %v376_v53 = vld [vmem:[%s769_s2 + $0x38] sm:$0xf0]  ;;  %v499_v54 = vld [vmem:[%s769_s2 + $0xb4] sm:$0xf]  ;;  %v375_v56 = vor.u32 %v484_v48, %v374_v47 }
   0xe   :  { %277 = vmatpush.bf16.msra.mxu3 %v459_v38  ;;  %v440_v55 = vld [vmem:[%s769_s2 + $0xb8] sm:$0xf0]  ;;  %v439_v57 = vor.u32 %v500_v51, %v438_v49  ;;  %v379_v58 = vor.u32 %v483_v52, %v376_v53  ;;  %v366_v59 = vld [vmem:[%s769_s2 + $0x20] sm:$0xf]  ;;  %v482_v60 = vld [vmem:[%s769_s2 + $0x24] sm:$0xf0] }
   0xf   :  { %v430_v61 = vld [vmem:[%s769_s2 + $0xa0] sm:$0xf]  ;;  %v443_v62 = vor.u32 %v499_v54, %v440_v55  ;;  %v498_v63 = vld [vmem:[%s769_s2 + $0xa4] sm:$0xf0]  ;;  %v481_v0 = vld [vmem:[%s769_s2 + $0x24] sm:$0xf]  ;;  %v367_v4 = vor.u32 %v482_v60, %v366_v59 }
  0x10   :  { %239 = vmatpush.bf16.msra.mxu0 %v383_v44  ;;  %v368_v1 = vld [vmem:[%s769_s2 + $0x28] sm:$0xf0]  ;;  %v497_v2 = vld [vmem:[%s769_s2 + $0xa4] sm:$0xf]  ;;  %v431_v5 = vor.u32 %v498_v63, %v430_v61  ;;  %v358_v7 = vld [vmem:[%s769_s2 + $0x10] sm:$0xf] }
  0x11   :  { %252 = vmatpush.bf16.msra.mxu1 %v447_v45  ;;  %265 = vmatpush.bf16.msra.mxu2 %v387_v46  ;;  %v432_v3 = vld [vmem:[%s769_s2 + $0xa8] sm:$0xf0]  ;;  %v371_v6 = vor.u32 %v481_v0, %v368_v1  ;;  %v480_v8 = vld [vmem:[%s769_s2 + $0x14] sm:$0xf0]  ;;  %v422_v9 = vld [vmem:[%s769_s2 + $0x90] sm:$0xf] }
  0x12   :  { %278 = vmatpush.bf16.msra.mxu3 %v451_v50  ;;  %v435_v10 = vor.u32 %v497_v2, %v432_v3  ;;  %v496_v11 = vld [vmem:[%s769_s2 + $0x94] sm:$0xf0]  ;;  %v479_v12 = vld [vmem:[%s769_s2 + $0x14] sm:$0xf]  ;;  %v360_v13 = vld [vmem:[%s769_s2 + $0x18] sm:$0xf0]  ;;  %v359_v16 = vor.u32 %v480_v8, %v358_v7 }
  0x13   :  { %v495_v14 = vld [vmem:[%s769_s2 + $0x94] sm:$0xf]  ;;  %v424_v15 = vld [vmem:[%s769_s2 + $0x98] sm:$0xf0]  ;;  %v36_v17 = vld [vmem:[%s770_s1] sm:$0xff]  ;;  %v423_v18 = vor.u32 %v496_v11, %v422_v9  ;;  %v363_v19 = vor.u32 %v479_v12, %v360_v13  ;;  %v525_v55 = vmov 0  }
  0x14   :  { %240 = vmatpush.bf16.msra.mxu0 %v375_v56  ;;  %v350_v20 = vld [vmem:[%s769_s2] sm:$0xf]  ;;  %v478_v21 = vld [vmem:[%s769_s2 + $0x4] sm:$0xf0]  ;;  %v427_v23 = vor.u32 %v495_v14, %v424_v15  ;;  %v477_v25 = vld [vmem:[%s769_s2 + $0x4] sm:$0xf]  ;;  %v70_v29 = vunpack.c.l.b16 %v36_v17  ;;  %v71_v31 = vunpack.c.h.b16 %v36_v17  ;;  %520 = vset.pattern.permute.xlu1 %v525_v55 }
  0x15   :  { %253 = vmatpush.bf16.msra.mxu1 %v439_v57  ;;  %266 = vmatpush.bf16.msra.mxu2 %v379_v58  ;;  %v414_v22 = vld [vmem:[%s769_s2 + $0x80] sm:$0xf]  ;;  %v494_v24 = vld [vmem:[%s769_s2 + $0x84] sm:$0xf0]  ;;  %v352_v26 = vld [vmem:[%s769_s2 + $0x8] sm:$0xf0]  ;;  %v351_v30 = vor.u32 %v478_v21, %v350_v20 }
  0x16   :  { %279 = vmatpush.bf16.msra.mxu3 %v443_v62  ;;  %v493_v27 = vld [vmem:[%s769_s2 + $0x84] sm:$0xf]  ;;  %v416_v28 = vld [vmem:[%s769_s2 + $0x88] sm:$0xf0]  ;;  %v415_v32 = vor.u32 %v494_v24, %v414_v22  ;;  %v355_v33 = vor.u32 %v477_v25, %v352_v26  ;;  %v72_v35 = vpack.c.b16 %v70_v29, %v70_v29  ;;  %v73_v36 = vpack.c.b16 %v71_v31, %v71_v31  ;;  %s524_s2 = smov 64  }
  0x17   :  { %v419_v34 = vor.u32 %v493_v27, %v416_v28  ;;  %v25_v52 = vld [vmem:[%s771_s0 + $0x10] sm:$0x3]  ;;  %v316_v54 = vld [vmem:[%s772_s4] sm:$0xff]  ;;  %521 = vset.pattern.permute.xlu0 %v525_v55  ;;  %v522_v60 = vld [vmem:[%s771_s0 + $0x8] sm:$0xff] }
  0x18   :  { %241 = vmatpush.bf16.msra.mxu0 %v367_v4  ;;  %v30_v53 = vunpack.c.l.bf16 %v25_v52  ;;  %v523_v61 = vld [vmem:[%s771_s0] sm:$0xff] }
  0x19   :  { %254 = vmatpush.bf16.msra.mxu1 %v431_v5  ;;  %267 = vmatpush.bf16.msra.mxu2 %v371_v6  ;;  %v307_v62 = vld [vmem:[%s773_s3] sm:$0xf] }
  0x1a   :  { %280 = vmatpush.bf16.msra.mxu3 %v435_v10  ;;  %35 = vst [vmem:[#allocation2 + $0x20] sm:$0xf] %v30_v53 }
  0x1c   :  { %242 = vmatpush.bf16.msra.mxu0 %v359_v16 }
  0x1d   :  { %255 = vmatpush.bf16.msra.mxu1 %v423_v18  ;;  %268 = vmatpush.bf16.msra.mxu2 %v363_v19 }
  0x1e   :  { %281 = vmatpush.bf16.msra.mxu3 %v427_v23 }
  0x20   :  { %243 = vmatpush.bf16.msra.mxu0 %v351_v30 }
  0x21   :  { %256 = vmatpush.bf16.msra.mxu1 %v415_v32  ;;  %269 = vmatpush.bf16.msra.mxu2 %v355_v33 }
  0x22   :  { %282 = vmatpush.bf16.msra.mxu3 %v419_v34 }
  0x23   :  { %244 = vmatmul.bf16.vlgmr.msra.gmra.mxu0 %v72_v35 }
  0x24   :  { %257 = vmatmul.bf16.vlgmr.msra.gmra.mxu1 %v73_v36  ;;  %270 = vmatmul.bf16.vlgmr.msra.gmra.mxu2 %v72_v35 }
  0x25   :  { %283 = vmatmul.bf16.vlgmr.msra.gmra.mxu3 %v73_v36 }
  0xa0   :  { %v245_v37 = vpop.f32.mrf.mxu0 }
  0xa1   :  { %v258_v38 = vpop.f32.mrf.mxu1 }
  0xa2   :  { %v259_v39 = vadd.f32 %v258_v38, %v245_v37 }
  0xa4   :  { %289 = vrot.lane.b32.xlu0 %v259_v39, %s524_s2 }
  0xa7   :  { %v271_v40 = vpop.f32.mrf.mxu2 }
  0xa8   :  { %v284_v41 = vpop.f32.mrf.mxu3  ;;  %v247_v42 = vpop.f32.mrf.mxu0 }
  0xa9   :  { %v285_v43 = vadd.f32 %v284_v41, %v271_v40  ;;  %v260_v44 = vpop.f32.mrf.mxu1 }
  0xac   :  { %294 = vrot.lane.b32.xlu0 %v285_v43, %s524_s2 }
  0xaf   :  { %v273_v45 = vpop.f32.mrf.mxu2 }
  0xb0   :  { %v286_v46 = vpop.f32.mrf.mxu3 }
 0x116   :  { %v290_v47 = vpop.permute.xlu0 %289 }
 0x117   :  { %v292_v49 = vmax.f32 %v259_v39, %v290_v47 }
 0x11e   :  { %v295_v48 = vpop.permute.xlu0 %294 }
 0x11f   :  { %v297_v50 = vmax.f32 %v285_v43, %v295_v48 }
 0x121   :  { %v298_v51 = vmax.f32 %v292_v49, %v297_v50 }
 0x123   :  { %302 = vrot.lane.b32.xlu1 %v298_v51, %s524_s2  ;;  %300 = vst.msk [vmem:[#allocation2 + $0x24] sm:$0xf] %vm299_vm0, %v298_v51 }
 0x12b   :  { %319 = vperm.xlu1 %520, %v316_v54  }
 0x195   :  { %v303_v56 = vpop.permute.xlu1 %302 }
 0x196   :  { %306 = vst.msk [vmem:[#allocation2 + $0x20] sm:$0xf0] %vm305_vm1, %v303_v56 }
 0x19d   :  { %v312_v57 = vld [vmem:[#allocation2 + $0x20] sm:$0xff]  ;;  %v320_v63 = vpop.permute.xlu1 %319 }
 0x19e   :  { %v315_v58 = vpack.c.bf16 %v312_v57, %v312_v57 }
 0x1a0   :  { %v328_v59 = vsel %vm326_vm2, %v315_v58, 0 }
 0x1a1   :  { %335 = vmatpush.bf16.msrb.mxu0 %v328_v59 }
 0x1a5   :  { %336 = vmatpush.bf16.msrb.mxu0 %v522_v60 }
 0x1a9   :  { %337 = vmatpush.bf16.msrb.mxu0 %v523_v61 }
 0x1ac   :  { %476 = vmatmul.msk.bf16.vlgmr.msrb.gmra.mxu0 %vm322_vm3, %v307_v62 }
 0x229   :  { %v339_v0 = vpop.f32.mrf.mxu0 }
 0x22a   :  { %v340_v1 = vadd.f32 %v339_v0, %v320_v63 }
 0x22c   :  { %343 = vst [vmem:[%s774_s5] sm:$0xff] %v340_v1 }
 0x231   :  { %v341_v2 = vpop.f32.mrf.mxu0 }

</bundles_post_ra>
